<compile_context>
chip_gen: v5e
topology: v5e:2x2
jax: 0.10.0
libtpu: 0.0.40
codegen_flags: <defaults>
</compile_context>

<pallas_src>
import jax
import jax.numpy as jnp
from jax.experimental import pallas as pl
from jax.experimental.pallas import tpu as pltpu

_EPS = 1e-5  # PyTorch InstanceNorm2d default eps (affine=False, no running stats)


# ----------------------------- in-kernel building blocks -----------------------------

def _conv3x3_in_relu(pad_ref, wmat, nb, ho, wo, cin, cout):
    """3x3 'same' conv + InstanceNorm2d(affine=False) + ReLU.

    The conv input lives in the zero-bordered scratch `pad_ref`:
      pad_ref[:, 1:ho+1, 1:wo+1, :cin] = input, 1-pixel ring = 0
    so the 'same' padding is free here.  Returns (nb, ho*wo, cout) float32.
    """
    # Two-stage im2col; K order = (dy, dx, cin) to match w.reshape(9*cin, cout).
    #   stage 1: dx shifts are sublane-axis slices of the scratch (only dx=1,2 misaligned)
    #   stage 2: dy shifts slice the leading H axis of the intermediate (free)
    rows = jnp.concatenate(
        [pad_ref[:, :, dx:dx + wo, :cin] for dx in range(3)], axis=-1)   # (nb, ho+2, wo, 3*cin)
    cols = jnp.concatenate(
        [rows[:, dy:dy + ho, :, :] for dy in range(3)], axis=-1)         # (nb, ho,   wo, 9*cin)

    # Whole batch folded into the MXU M dim: one matmul pass per conv.
    m = nb * ho * wo
    y = jnp.dot(cols.reshape(m, 9 * cin), wmat,
                preferred_element_type=jnp.float32)                      # (m, cout)

    # InstanceNorm2d: per-image, per-channel mean/var (biased) over the spatial dims.
    # The conv bias (a per-channel constant) is exactly cancelled by the mean subtraction,
    # so it is never added in the kernel.
    y = y.reshape(nb, ho * wo, cout)
    mu = jnp.mean(y, axis=1, keepdims=True)
    var = jnp.mean(jnp.square(y - mu), axis=1, keepdims=True)
    return jnp.maximum((y - mu) * jax.lax.rsqrt(var + _EPS), 0.0)        # (nb, ho*wo, cout)


def _down_fused_kernel(x_ref, w1_ref, w2_ref, o_ref, pad_ref):
    # x_ref  : (nb, H, Wo, 2*Cin)  NHWC input with the W pooling window folded onto lanes
    # w1_ref : (9*Cin,  Cout)
    # w2_ref : (9*Cout, Cout)
    # o_ref  : (nb, Ho, Wo, Cout)
    # pad_ref: (nb, Ho+2, Wo+2, max(Cin, Cout))  zero-bordered scratch shared by both convs
    nb, H, wo, two_cin = x_ref.shape
    cin = two_cin // 2
    cout = w1_ref.shape[1]
    ho = H // 2

    # Zero the scratch each step (cheap, ~tens of KB).  Only interiors are written below,
    # so the 1-px ring stays zero for both convs.  (Zeroing only on step 0 would be wrong
    # under "parallel" grid sharding: each core has its own scratch instance.)
    pad_ref[...] = jnp.zeros_like(pad_ref)

    # ---- MaxPool2d(2), relayout-light ----
    # W direction: the two window columns sit side by side on the lane axis, so the max is
    # two lane slices + a VPU max (no stride-2 sublane gathers).
    # H direction: free leading-axis split + max of the two slabs.
    x = x_ref[...]
    xw = jnp.maximum(x[..., :cin], x[..., cin:])                  # (nb, H, Wo, Cin)
    xr = xw.reshape(nb, ho, 2, wo, cin)                           # free leading-dim split
    pooled = jnp.maximum(xr[:, :, 0, :, :], xr[:, :, 1, :, :])    # (nb, Ho, Wo, Cin)

    # ---- DoubleConv, fully VMEM resident (no HBM round trips) ----
    pad_ref[:, 1:ho + 1, 1:wo + 1, :cin] = pooled
    y1 = _conv3x3_in_relu(pad_ref, w1_ref[...], nb, ho, wo, cin, cout)

    pad_ref[:, 1:ho + 1, 1:wo + 1, :cout] = y1.reshape(nb, ho, wo, cout)
    y2 = _conv3x3_in_relu(pad_ref, w2_ref[...], nb, ho, wo, cout, cout)

    o_ref[...] = y2.reshape(nb, ho, wo, cout).astype(o_ref.dtype)


# ----------------------------- wrapper -----------------------------

def _default_grid_steps(n):
    """One big step on single-TC chips (v5e/v6e); two 'parallel' steps on megacore parts."""
    if n <= 1:
        return 1
    kind = ""
    try:
        kind = jax.devices()[0].device_kind.lower()
    except Exception:  # pragma: no cover - defensive
        pass
    single_tc = any(t in kind for t in ("v5e", "v5 lite", "v6e", "v6 lite"))
    steps = 1 if single_tc else min(2, n)
    while n % steps:
        steps -= 1
    return steps


def down_forward(x_nchw, params, grid_steps=None):
    """Forward pass of `Down` for an NCHW input, returns NCHW output."""
    w1, b1, w2, b2 = params
    del b1, b2  # bias is a mathematical no-op under affine-less InstanceNorm
    N, Cin, H, W = x_nchw.shape
    assert H % 2 == 0 and W % 2 == 0, "MaxPool2d(2) requires even spatial dims"
    Cout = w1.shape[-1]
    assert w1.shape == (3, 3, Cin, Cout) and w2.shape == (3, 3, Cout, Cout)
    Ho, Wo = H // 2, W // 2

    if grid_steps is None:
        grid_steps = _default_grid_steps(N)
    assert N % grid_steps == 0
    nb = N // grid_steps
    cmax = max(Cin, Cout)

    # NCHW -> NHWC (channels on lanes), then fold the W pooling window onto the lane axis:
    # (N, H, W, Cin) -> (N, H, Wo, 2*Cin).  Both preserve element order (free in HBM).
    # TODO(synk): at production sizes, do the NCHW<->NHWC relayout once per network,
    # not once per Down block.
    x = jnp.transpose(x_nchw, (0, 2, 3, 1)).reshape(N, H, Wo, 2 * Cin)
    w1m = w1.reshape(9 * Cin, Cout)    # (dy, dx, cin) flattened onto the K axis
    w2m = w2.reshape(9 * Cout, Cout)

    flops = 2 * N * Ho * Wo * (9 * Cin * Cout + 9 * Cout * Cout)
    cost = pl.CostEstimate(
        flops=flops,
        transcendentals=2 * N * Cout,  # one rsqrt per channel per image per conv
        bytes_accessed=4 * (x.size + w1m.size + w2m.size + N * Ho * Wo * Cout))

    out = pl.pallas_call(
        _down_fused_kernel,
        out_shape=jax.ShapeDtypeStruct((N, Ho, Wo, Cout), x_nchw.dtype),
        grid=(grid_steps,),
        in_specs=[
            pl.BlockSpec((nb, H, Wo, 2 * Cin), lambda i: (i, 0, 0, 0)),
            pl.BlockSpec((9 * Cin, Cout), lambda i: (0, 0)),
            pl.BlockSpec((9 * Cout, Cout), lambda i: (0, 0)),
        ],
        out_specs=pl.BlockSpec((nb, Ho, Wo, Cout), lambda i: (i, 0, 0, 0)),
        scratch_shapes=[pltpu.VMEM((nb, Ho + 2, Wo + 2, cmax), jnp.float32)],
        compiler_params=pltpu.CompilerParams(dimension_semantics=("parallel",)),
        cost_estimate=cost,
    )(x, w1m, w2m)

    return jnp.transpose(out, (0, 3, 1, 2))  # NHWC -> NCHW


# ----------------------------- parameters -----------------------------

def init_down_params(key, in_channels, out_channels):
    """Deterministic synthetic params matching PyTorch Conv2d default init scale."""
    ks = jax.random.split(key, 4)

    def conv_init(kw, kb, cin, cout):
        fan_in = cin * 9
        bound = 1.0 / float(jnp.sqrt(fan_in))
        w = jax.random.uniform(kw, (3, 3, cin, cout), jnp.float32, -bound, bound)
        b = jax.random.uniform(kb, (cout,), jnp.float32, -bound, bound)
        return w, b

    w1, b1 = conv_init(ks[0], ks[1], in_channels, out_channels)
    w2, b2 = conv_init(ks[2], ks[3], out_channels, out_channels)
    return (w1, b1, w2, b2)


# ----------------------------- pure-JAX reference -----------------------------

def _down_reference(x_nchw, params):
    # Reference keeps the conv bias (as PyTorch does) — it is exactly cancelled by the
    # InstanceNorm mean subtraction, which is why the kernel can drop it.
    w1, b1, w2, b2 = params
    x = jnp.transpose(x_nchw, (0, 2, 3, 1))
    x = jax.lax.reduce_window(x, -jnp.inf, jax.lax.max,
                              (1, 2, 2, 1), (1, 2, 2, 1), "VALID")

    def block(x, w, b):
        y = jax.lax.conv_general_dilated(
            x, w, window_strides=(1, 1), padding="SAME",
            dimension_numbers=("NHWC", "HWIO", "NHWC"))
        y = y + b
        mean = jnp.mean(y, axis=(1, 2), keepdims=True)
        var = jnp.mean(jnp.square(y - mean), axis=(1, 2), keepdims=True)
        y = (y - mean) / jnp.sqrt(var + _EPS)
        return jnp.maximum(y, 0.0)

    x = block(x, w1, b1)
    x = block(x, w2, b2)
    return jnp.transpose(x, (0, 3, 1, 2))


# ----------------------------- main -----------------------------

if __name__ == "__main__":
    key = jax.random.PRNGKey(0)
    k_x, k_p = jax.random.split(key)

    N, C_IN, C_OUT, H, W = 2, 4, 8, 16, 16
    x = jax.random.normal(k_x, (N, C_IN, H, W), dtype=jnp.float32)   # NCHW like PyTorch
    params = init_down_params(k_p, C_IN, C_OUT)

    ref = jax.block_until_ready(_down_reference(x, params))

    # Default grid (chip-dependent: 1 step on v5e/v6e, 2 parallel steps otherwise).
    out = jax.block_until_ready(down_forward(x, params))
    assert out.shape == (N, C_OUT, H // 2, W // 2), out.shape
    assert jnp.allclose(out, ref, rtol=1e-3, atol=1e-3), float(jnp.max(jnp.abs(out - ref)))

    # Exercise both packing variants explicitly so either chip path is validated.
    for steps in (1, 2):
        o = jax.block_until_ready(down_forward(x, params, grid_steps=steps))
        assert jnp.allclose(o, ref, rtol=1e-3, atol=1e-3), (steps, float(jnp.max(jnp.abs(o - ref))))

    print("KERNEL_OK")
</pallas_src>

<mosaic_0001>
module attributes {stable_mosaic.version = 11 : i64} {
  func.func @_down_fused_kernel(%arg0: i32, %arg1: memref<1x16x8x8xf32, #tpu.memory_space<vmem>>, %arg2: memref<36x8xf32, #tpu.memory_space<vmem>>, %arg3: memref<72x8xf32, #tpu.memory_space<vmem>>, %arg4: memref<1x8x8x8xf32, #tpu.memory_space<vmem>>, %arg5: memref<1x10x10x8xf32, #tpu.memory_space<vmem>>) attributes {dimension_semantics = [#tpu.dimension_semantics<parallel>], iteration_bounds = array<i64: 2>, scalar_prefetch = 0 : i64, scratch_operands = 1 : i64, tpu.core_type = #tpu.core_type<tc>, window_params = [{transform_indices = @transform_0, window_bounds = array<i64: 1, 16, 8, 8>}, {pipeline_mode = #tpu.pipeline_mode<synchronous>, transform_indices = @transform_1, window_bounds = array<i64: 36, 8>}, {pipeline_mode = #tpu.pipeline_mode<synchronous>, transform_indices = @transform_2, window_bounds = array<i64: 72, 8>}, {transform_indices = @transform_3, window_bounds = array<i64: 1, 8, 8, 8>}]} {
    %cst = arith.constant 0.000000e+00 : f32
    %0 = vector.broadcast %cst : f32 to vector<1x10x10x8xf32>
    %c0 = arith.constant 0 : index
    %c0_0 = arith.constant 0 : index
    %c0_1 = arith.constant 0 : index
    %c0_2 = arith.constant 0 : index
    %1 = vector.load %arg5[%c0, %c0_0, %c0_1, %c0_2] : memref<1x10x10x8xf32, #tpu.memory_space<vmem>>, vector<1x10x10x8xf32>
    tpu.vector_store %arg5[%c0, %c0_0, %c0_1, %c0_2], %0 {strides = array<i32>} : memref<1x10x10x8xf32, #tpu.memory_space<vmem>>, vector<1x10x10x8xf32>,
    %c0_3 = arith.constant 0 : index
    %c0_4 = arith.constant 0 : index
    %c0_5 = arith.constant 0 : index
    %c0_6 = arith.constant 0 : index
    %2 = vector.load %arg1[%c0_3, %c0_4, %c0_5, %c0_6] : memref<1x16x8x8xf32, #tpu.memory_space<vmem>>, vector<1x16x8x8xf32>
    %3 = vector.extract_strided_slice %2 {offsets = [0, 0, 0, 0], sizes = [1, 16, 8, 4], strides = [1, 1, 1, 1]} : vector<1x16x8x8xf32> to vector<1x16x8x4xf32>
    %4 = vector.extract_strided_slice %2 {offsets = [0, 0, 0, 4], sizes = [1, 16, 8, 4], strides = [1, 1, 1, 1]} : vector<1x16x8x8xf32> to vector<1x16x8x4xf32>
    %5 = arith.maximumf %3, %4 : vector<1x16x8x4xf32>
    %6 = vector.shape_cast %5 : vector<1x16x8x4xf32> to vector<1x8x2x8x4xf32>
    %7 = vector.extract_strided_slice %6 {offsets = [0, 0, 0, 0, 0], sizes = [1, 8, 1, 8, 4], strides = [1, 1, 1, 1, 1]} : vector<1x8x2x8x4xf32> to vector<1x8x1x8x4xf32>
    %8 = vector.shape_cast %7 : vector<1x8x1x8x4xf32> to vector<1x8x8x4xf32>
    %9 = vector.extract_strided_slice %6 {offsets = [0, 0, 1, 0, 0], sizes = [1, 8, 1, 8, 4], strides = [1, 1, 1, 1, 1]} : vector<1x8x2x8x4xf32> to vector<1x8x1x8x4xf32>
    %10 = vector.shape_cast %9 : vector<1x8x1x8x4xf32> to vector<1x8x8x4xf32>
    %11 = arith.maximumf %8, %10 : vector<1x8x8x4xf32>
    %c0_7 = arith.constant 0 : index
    %c1 = arith.constant 1 : index
    %c1_8 = arith.constant 1 : index
    %c0_9 = arith.constant 0 : index
    %12 = vector.load %arg5[%c0_7, %c1, %c1_8, %c0_9] : memref<1x10x10x8xf32, #tpu.memory_space<vmem>>, vector<1x8x8x4xf32>
    tpu.vector_store %arg5[%c0_7, %c1, %c1_8, %c0_9], %11 {strides = array<i32>} : memref<1x10x10x8xf32, #tpu.memory_space<vmem>>, vector<1x8x8x4xf32>,
    %c0_10 = arith.constant 0 : index
    %c0_11 = arith.constant 0 : index
    %13 = vector.load %arg2[%c0_10, %c0_11] : memref<36x8xf32, #tpu.memory_space<vmem>>, vector<36x8xf32>
    %c0_12 = arith.constant 0 : index
    %c0_13 = arith.constant 0 : index
    %c0_14 = arith.constant 0 : index
    %c0_15 = arith.constant 0 : index
    %14 = vector.load %arg5[%c0_12, %c0_13, %c0_14, %c0_15] : memref<1x10x10x8xf32, #tpu.memory_space<vmem>>, vector<1x10x8x4xf32>
    %c0_16 = arith.constant 0 : index
    %c0_17 = arith.constant 0 : index
    %c1_18 = arith.constant 1 : index
    %c0_19 = arith.constant 0 : index
    %15 = vector.load %arg5[%c0_16, %c0_17, %c1_18, %c0_19] : memref<1x10x10x8xf32, #tpu.memory_space<vmem>>, vector<1x10x8x4xf32>
    %c0_20 = arith.constant 0 : index
    %c0_21 = arith.constant 0 : index
    %c2 = arith.constant 2 : index
    %c0_22 = arith.constant 0 : index
    %16 = vector.load %arg5[%c0_20, %c0_21, %c2, %c0_22] : memref<1x10x10x8xf32, #tpu.memory_space<vmem>>, vector<1x10x8x4xf32>
    %17 = tpu.concatenate %14, %15, %16 in 3 : vector<1x10x8x4xf32>, vector<1x10x8x4xf32>, vector<1x10x8x4xf32> -> vector<1x10x8x12xf32>
    %18 = vector.extract_strided_slice %17 {offsets = [0, 0, 0, 0], sizes = [1, 8, 8, 12], strides = [1, 1, 1, 1]} : vector<1x10x8x12xf32> to vector<1x8x8x12xf32>
    %19 = vector.extract_strided_slice %17 {offsets = [0, 1, 0, 0], sizes = [1, 8, 8, 12], strides = [1, 1, 1, 1]} : vector<1x10x8x12xf32> to vector<1x8x8x12xf32>
    %20 = vector.extract_strided_slice %17 {offsets = [0, 2, 0, 0], sizes = [1, 8, 8, 12], strides = [1, 1, 1, 1]} : vector<1x10x8x12xf32> to vector<1x8x8x12xf32>
    %21 = tpu.concatenate %18, %19, %20 in 3 : vector<1x8x8x12xf32>, vector<1x8x8x12xf32>, vector<1x8x8x12xf32> -> vector<1x8x8x36xf32>
    %22 = vector.shape_cast %21 : vector<1x8x8x36xf32> to vector<64x36xf32>
    %cst_23 = arith.constant dense<0.000000e+00> : vector<64x8xf32>
    %23 = tpu.matmul %22, %13, %cst_23 {dimension_numbers = #tpu.dot_dimension_numbers<[1], [0], [0], [1], [0, 0, 1, 1], [], []>} : vector<64x36xf32>, vector<36x8xf32>, vector<64x8xf32> -> vector<64x8xf32>
    %24 = vector.shape_cast %23 : vector<64x8xf32> to vector<1x64x8xf32>
    %cst_24 = arith.constant dense<0.000000e+00> : vector<1x8xf32>
    %25 = vector.multi_reduction <add>, %24, %cst_24 [1] : vector<1x64x8xf32> to vector<1x8xf32>
    %26 = vector.shape_cast %25 : vector<1x8xf32> to vector<1x1x8xf32>
    %cst_25 = arith.constant 6.400000e+01 : f32
    %27 = vector.broadcast %cst_25 : f32 to vector<1x1x8xf32>
    %28 = arith.divf %26, %27 : vector<1x1x8xf32>
    %29 = vector.broadcast %28 : vector<1x1x8xf32> to vector<1x64x8xf32>
    %30 = arith.subf %24, %29 : vector<1x64x8xf32>
    %31 = arith.mulf %30, %30 : vector<1x64x8xf32>
    %cst_26 = arith.constant dense<0.000000e+00> : vector<1x8xf32>
    %32 = vector.multi_reduction <add>, %31, %cst_26 [1] : vector<1x64x8xf32> to vector<1x8xf32>
    %33 = vector.shape_cast %32 : vector<1x8xf32> to vector<1x1x8xf32>
    %cst_27 = arith.constant 6.400000e+01 : f32
    %34 = vector.broadcast %cst_27 : f32 to vector<1x1x8xf32>
    %35 = arith.divf %33, %34 : vector<1x1x8xf32>
    %36 = vector.broadcast %28 : vector<1x1x8xf32> to vector<1x64x8xf32>
    %37 = arith.subf %24, %36 : vector<1x64x8xf32>
    %cst_28 = arith.constant 9.99999974E-6 : f32
    %38 = vector.broadcast %cst_28 : f32 to vector<1x1x8xf32>
    %39 = arith.addf %35, %38 : vector<1x1x8xf32>
    %40 = math.rsqrt %39 : vector<1x1x8xf32>
    %41 = vector.broadcast %40 : vector<1x1x8xf32> to vector<1x64x8xf32>
    %42 = arith.mulf %37, %41 : vector<1x64x8xf32>
    %cst_29 = arith.constant 0.000000e+00 : f32
    %43 = vector.broadcast %cst_29 : f32 to vector<1x64x8xf32>
    %44 = arith.maximumf %42, %43 : vector<1x64x8xf32>
    %45 = vector.shape_cast %44 : vector<1x64x8xf32> to vector<1x8x8x8xf32>
    %c0_30 = arith.constant 0 : index
    %c1_31 = arith.constant 1 : index
    %c1_32 = arith.constant 1 : index
    %c0_33 = arith.constant 0 : index
    %46 = vector.load %arg5[%c0_30, %c1_31, %c1_32, %c0_33] : memref<1x10x10x8xf32, #tpu.memory_space<vmem>>, vector<1x8x8x8xf32>
    tpu.vector_store %arg5[%c0_30, %c1_31, %c1_32, %c0_33], %45 {strides = array<i32>} : memref<1x10x10x8xf32, #tpu.memory_space<vmem>>, vector<1x8x8x8xf32>,
    %c0_34 = arith.constant 0 : index
    %c0_35 = arith.constant 0 : index
    %47 = vector.load %arg3[%c0_34, %c0_35] : memref<72x8xf32, #tpu.memory_space<vmem>>, vector<72x8xf32>
    %c0_36 = arith.constant 0 : index
    %c0_37 = arith.constant 0 : index
    %c0_38 = arith.constant 0 : index
    %c0_39 = arith.constant 0 : index
    %48 = vector.load %arg5[%c0_36, %c0_37, %c0_38, %c0_39] : memref<1x10x10x8xf32, #tpu.memory_space<vmem>>, vector<1x10x8x8xf32>
    %c0_40 = arith.constant 0 : index
    %c0_41 = arith.constant 0 : index
    %c1_42 = arith.constant 1 : index
    %c0_43 = arith.constant 0 : index
    %49 = vector.load %arg5[%c0_40, %c0_41, %c1_42, %c0_43] : memref<1x10x10x8xf32, #tpu.memory_space<vmem>>, vector<1x10x8x8xf32>
    %c0_44 = arith.constant 0 : index
    %c0_45 = arith.constant 0 : index
    %c2_46 = arith.constant 2 : index
    %c0_47 = arith.constant 0 : index
    %50 = vector.load %arg5[%c0_44, %c0_45, %c2_46, %c0_47] : memref<1x10x10x8xf32, #tpu.memory_space<vmem>>, vector<1x10x8x8xf32>
    %51 = tpu.concatenate %48, %49, %50 in 3 : vector<1x10x8x8xf32>, vector<1x10x8x8xf32>, vector<1x10x8x8xf32> -> vector<1x10x8x24xf32>
    %52 = vector.extract_strided_slice %51 {offsets = [0, 0, 0, 0], sizes = [1, 8, 8, 24], strides = [1, 1, 1, 1]} : vector<1x10x8x24xf32> to vector<1x8x8x24xf32>
    %53 = vector.extract_strided_slice %51 {offsets = [0, 1, 0, 0], sizes = [1, 8, 8, 24], strides = [1, 1, 1, 1]} : vector<1x10x8x24xf32> to vector<1x8x8x24xf32>
    %54 = vector.extract_strided_slice %51 {offsets = [0, 2, 0, 0], sizes = [1, 8, 8, 24], strides = [1, 1, 1, 1]} : vector<1x10x8x24xf32> to vector<1x8x8x24xf32>
    %55 = tpu.concatenate %52, %53, %54 in 3 : vector<1x8x8x24xf32>, vector<1x8x8x24xf32>, vector<1x8x8x24xf32> -> vector<1x8x8x72xf32>
    %56 = vector.shape_cast %55 : vector<1x8x8x72xf32> to vector<64x72xf32>
    %cst_48 = arith.constant dense<0.000000e+00> : vector<64x8xf32>
    %57 = tpu.matmul %56, %47, %cst_48 {dimension_numbers = #tpu.dot_dimension_numbers<[1], [0], [0], [1], [0, 0, 1, 1], [], []>} : vector<64x72xf32>, vector<72x8xf32>, vector<64x8xf32> -> vector<64x8xf32>
    %58 = vector.shape_cast %57 : vector<64x8xf32> to vector<1x64x8xf32>
    %cst_49 = arith.constant dense<0.000000e+00> : vector<1x8xf32>
    %59 = vector.multi_reduction <add>, %58, %cst_49 [1] : vector<1x64x8xf32> to vector<1x8xf32>
    %60 = vector.shape_cast %59 : vector<1x8xf32> to vector<1x1x8xf32>
    %cst_50 = arith.constant 6.400000e+01 : f32
    %61 = vector.broadcast %cst_50 : f32 to vector<1x1x8xf32>
    %62 = arith.divf %60, %61 : vector<1x1x8xf32>
    %63 = vector.broadcast %62 : vector<1x1x8xf32> to vector<1x64x8xf32>
    %64 = arith.subf %58, %63 : vector<1x64x8xf32>
    %65 = arith.mulf %64, %64 : vector<1x64x8xf32>
    %cst_51 = arith.constant dense<0.000000e+00> : vector<1x8xf32>
    %66 = vector.multi_reduction <add>, %65, %cst_51 [1] : vector<1x64x8xf32> to vector<1x8xf32>
    %67 = vector.shape_cast %66 : vector<1x8xf32> to vector<1x1x8xf32>
    %cst_52 = arith.constant 6.400000e+01 : f32
    %68 = vector.broadcast %cst_52 : f32 to vector<1x1x8xf32>
    %69 = arith.divf %67, %68 : vector<1x1x8xf32>
    %70 = vector.broadcast %62 : vector<1x1x8xf32> to vector<1x64x8xf32>
    %71 = arith.subf %58, %70 : vector<1x64x8xf32>
    %cst_53 = arith.constant 9.99999974E-6 : f32
    %72 = vector.broadcast %cst_53 : f32 to vector<1x1x8xf32>
    %73 = arith.addf %69, %72 : vector<1x1x8xf32>
    %74 = math.rsqrt %73 : vector<1x1x8xf32>
    %75 = vector.broadcast %74 : vector<1x1x8xf32> to vector<1x64x8xf32>
    %76 = arith.mulf %71, %75 : vector<1x64x8xf32>
    %cst_54 = arith.constant 0.000000e+00 : f32
    %77 = vector.broadcast %cst_54 : f32 to vector<1x64x8xf32>
    %78 = arith.maximumf %76, %77 : vector<1x64x8xf32>
    %79 = vector.shape_cast %78 : vector<1x64x8xf32> to vector<1x8x8x8xf32>
    %c0_55 = arith.constant 0 : index
    %c0_56 = arith.constant 0 : index
    %c0_57 = arith.constant 0 : index
    %c0_58 = arith.constant 0 : index
    %80 = vector.load %arg4[%c0_55, %c0_56, %c0_57, %c0_58] : memref<1x8x8x8xf32, #tpu.memory_space<vmem>>, vector<1x8x8x8xf32>
    tpu.vector_store %arg4[%c0_55, %c0_56, %c0_57, %c0_58], %79 {strides = array<i32>} : memref<1x8x8x8xf32, #tpu.memory_space<vmem>>, vector<1x8x8x8xf32>,
    return
  }
  func.func @transform_0(%arg0: i32) -> (i32, i32, i32, i32) {
    %c0_i32 = arith.constant 0 : i32
    %c0_i32_0 = arith.constant 0 : i32
    %c0_i32_1 = arith.constant 0 : i32
    %c0_i32_2 = arith.constant 0 : i32
    return %arg0, %c0_i32, %c0_i32_0, %c0_i32_1 : i32, i32, i32, i32
  }
  func.func @transform_1(%arg0: i32) -> (i32, i32) {
    %c0_i32 = arith.constant 0 : i32
    %c0_i32_0 = arith.constant 0 : i32
    %c0_i32_1 = arith.constant 0 : i32
    return %c0_i32, %c0_i32_0 : i32, i32
  }
  func.func @transform_2(%arg0: i32) -> (i32, i32) {
    %c0_i32 = arith.constant 0 : i32
    %c0_i32_0 = arith.constant 0 : i32
    %c0_i32_1 = arith.constant 0 : i32
    return %c0_i32, %c0_i32_0 : i32, i32
  }
  func.func @transform_3(%arg0: i32) -> (i32, i32, i32, i32) {
    %c0_i32 = arith.constant 0 : i32
    %c0_i32_0 = arith.constant 0 : i32
    %c0_i32_1 = arith.constant 0 : i32
    %c0_i32_2 = arith.constant 0 : i32
    return %arg0, %c0_i32, %c0_i32_0, %c0_i32_1 : i32, i32, i32, i32
  }
}

</mosaic_0001>

<bundles_post_ra>
// kernel: tpu_custom_call.1
= control target key start
LH: loop header
LB: loop body
LE: loop exit
PB: predicated region body
PF: predicated region fallthrough
CT: control target
= control target key end

     0   :  { %8 = vsyncpa [#allocation4], 0  ;;  %s1880_s0 = inlined_call_operand.vmem [shape: f32[2,16,8,8], index: 0, kind: input, shape index: {}]   ;;  %s1881_s1 = inlined_call_operand.vmem [shape: f32[36,8], index: 1, kind: input, shape index: {}]   ;;  %s1882_s2 = inlined_call_operand.vmem [shape: f32[72,8], index: 2, kind: input, shape index: {}]   ;;  %s1883_s3 = inlined_call_operand.hbm [shape: f32[2,8,8,8], index: 3, kind: output, shape index: {}]  }
   0x1   :  { %10 = vsyncpa [#allocation4 + $0x1], 0  ;;  %s1334_s12 = smov 0   ;;  %s1336_s13 = smov 0  }
   0x2   :  { %s1338_s14 = smov 0   ;;  %s1340_s15 = smov 0  }
   0x3 LB: > { %s1355_s16 = sadd.s32 4294967295, %s1302_s15   ;;  %s1140_s17 = sadd.s32 4294967294, %s1302_s15   ;;  %s1302_s15 = sphi %s1340_s15, %s1889_s15   ;;  %s1298_s14 = sphi %s1338_s14, %s1888_s14   ;;  %s1294_s13 = sphi %s1336_s13, %s1887_s13   ;;  %s1290_s12 = sphi %s1334_s12, %s1886_s12  }
   0x4   : > { %s1359_s18 = sadd.s32 1, %s1302_s15   ;;  %s91_s19 = sadd.s32 1, %s1298_s14 }
   0x5   : > { %s88_s20 = ssub.s32 %s1302_s15, %s1359_s18  ;;  %p101_p0 = scmp.ne.s32.totalorder %s1298_s14, %s1294_s13 }
   0x6   : > { %p89_p1 = scmp.eq.s32.totalorder %s88_s20, 0  ;;  %p102_p2 = scmp.eq.s32.totalorder %s1355_s16, 1 }
   0x7   : > { %p107_p3 = scmp.ne.s32.totalorder %s1294_s13, %s1290_s12  ;;  %p108_p4 = scmp.eq.s32.totalorder %s1140_s17, 1 }
   0x8   : > { %s1370_s21 = scalar_select %p89_p1, %s1298_s14, %s91_s19  }
   0x9   : > { %p1372_p5 = por %p102_p2, %p101_p0  ;;  %p1376_p6 = por %p108_p4, %p107_p3 }
   0xa   : > { %p1143_p7 = scmp.ge.s32.totalorder %s1302_s15, 1  ;;  %p140_p8 = scmp.lt.s32.totalorder %s1302_s15, 3 }
   0xc   : > { %p141_p9 = pnand %p1143_p7, %p140_p8 }
   0xd   : > { %p164_p10 = scmp.lt.s32.totalorder (!%p141_p9), %s1355_s16, 1  ;;  %s1304_s29 = smov (!%p141_p9), 124  }
   0xe   : > { %144 = sbr.rel (%p141_p9) target bundleno = 1154 (0x482), region = 32  ;;  %s1306_s30 = smov (!%p141_p9), 4  }
   0xf   : > { %s1307_s4 = smov (!%p141_p9), 8   ;;  %s1308_s5 = smov (!%p141_p9), 12  }
  0x10   : > { %s1309_s6 = smov (!%p141_p9), 24   ;;  %s1311_s26 = smov (!%p141_p9), 16  }
  0x11   : > { %s1312_s27 = smov (!%p141_p9), 48  }
  0x13   : > { %s165_s24 = scalar_select %p164_p10, %s1355_s16, 1  ;;  %vm169_vm0 = vcmask 64512   ;;  %vm171_vm1 = vcmask 58368   ;;  %v1305_v16 = vmov 0.0   ;;  %vm296_vm2 = vcmask 31744  }
  0x14   : > { %177 = vst.msk [vmem:[#allocation2 + $0x30] sm:$0xff] %vm169_vm0, %v1305_v16  ;;  %vm540_vm3 = vcmask 1043456   ;;  %vm506_vm4 = vcmask 195584   ;;  %vm497_vm5 = vcmask 97280   ;;  %vm515_vm6 = vcmask 293888  }
  0x15   : > { %s1169_s25 = sshll.u32 %s165_s24, 7  ;;  %178 = vst.msk [vmem:[#allocation2 + $0x38] sm:$0x3] %vm171_vm1, %v1305_v16  ;;  %vm816_vm11 = vcmask 130048   ;;  %vm901_vm12 = vcmask 588800   ;;  %vm892_vm13 = vcmask 392192  }
  0x16   : > { %s1387_s28 = scalar_lea.vmem %s1880_s0, %s1169_s25  ;;  %170 = vst.msk [vmem:[#allocation2] sm:$0xff] %vm169_vm0, %v1305_v16  ;;  %s1260_s25 = scalar_lea.hbm %s1883_s3, 128 }
  0x17   : > { %v1390_v0 = vld [vmem:[%s1387_s28 + $0x10] sm:$0xff]  ;;  %v1393_v1 = vld [vmem:[%s1387_s28] sm:$0xff]  ;;  %v1402_v3 = vld [vmem:[%s1387_s28 + $0x18] sm:$0xff]  ;;  %172 = vst.msk [vmem:[#allocation2 + $0x8] sm:$0x3] %vm171_vm1, %v1305_v16 }
  0x18   : > { %227 = vrot.lane.b32.xlu1 %v1390_v0, %s1304_s29  ;;  %223 = vrot.lane.b32.xlu0 %v1393_v1, %s1304_s29  ;;  %v195_v2 = vld [vmem:[%s1387_s28 + $0x20] sm:$0xff]  ;;  %v1405_v4 = vld [vmem:[%s1387_s28 + $0x8] sm:$0xff]  ;;  %173 = vst.msk [vmem:[#allocation2 + $0x10] sm:$0xff] %vm169_vm0, %v1305_v16 }
  0x19   : > { %231 = vrot.lane.b32.xlu2 %v195_v2, %s1304_s29  ;;  %v196_v5 = vld [vmem:[%s1387_s28 + $0x28] sm:$0xff]  ;;  %v1414_v6 = vld [vmem:[%s1387_s28 + $0x58] sm:$0xff]  ;;  %v1417_v7 = vld [vmem:[%s1387_s28 + $0x50] sm:$0xff]  ;;  %174 = vst.msk [vmem:[#allocation2 + $0x18] sm:$0x3] %vm171_vm1, %v1305_v16 }
  0x1a   : > { %v1420_v8 = vld [vmem:[%s1387_s28 + $0x30] sm:$0xff]  ;;  %v1429_v9 = vld [vmem:[%s1387_s28 + $0x60] sm:$0xff]  ;;  %v1432_v10 = vld [vmem:[%s1387_s28 + $0x38] sm:$0xff]  ;;  %175 = vst.msk [vmem:[#allocation2 + $0x20] sm:$0xff] %vm169_vm0, %v1305_v16 }
  0x1b   : > { %v1435_v11 = vld [vmem:[%s1387_s28 + $0x68] sm:$0xff]  ;;  %v1444_v12 = vld [vmem:[%s1387_s28 + $0x40] sm:$0xff]  ;;  %v1450_v14 = vld [vmem:[%s1387_s28 + $0x70] sm:$0xff]  ;;  %176 = vst.msk [vmem:[#allocation2 + $0x28] sm:$0x3] %vm171_vm1, %v1305_v16 }
  0x1c   : > { %v1447_v13 = vld [vmem:[%s1387_s28 + $0x48] sm:$0xff]  ;;  %v1459_v15 = vld [vmem:[%s1387_s28 + $0x78] sm:$0xff]  ;;  %179 = vst.msk [vmem:[#allocation2 + $0x40] sm:$0xff] %vm169_vm0, %v1305_v16 }
  0x1d   : > { %180 = vst.msk [vmem:[#allocation2 + $0x48] sm:$0x3] %vm171_vm1, %v1305_v16 }
  0x1e   : > { %181 = vst.msk [vmem:[#allocation2 + $0x50] sm:$0xff] %vm169_vm0, %v1305_v16 }
  0x1f   : > { %182 = vst.msk [vmem:[#allocation2 + $0x58] sm:$0x3] %vm171_vm1, %v1305_v16 }
  0x20   : > { %229 = vrot.lane.b32.xlu1 %v1402_v3, %s1304_s29  ;;  %225 = vrot.lane.b32.xlu0 %v1405_v4, %s1304_s29  ;;  %183 = vst.msk [vmem:[#allocation2 + $0x60] sm:$0xff] %vm169_vm0, %v1305_v16 }
  0x21   : > { %233 = vrot.lane.b32.xlu2 %v196_v5, %s1304_s29  ;;  %184 = vst.msk [vmem:[#allocation2 + $0x68] sm:$0x3] %vm171_vm1, %v1305_v16 }
  0x22   : > { %185 = vst.msk [vmem:[#allocation2 + $0x70] sm:$0xff] %vm169_vm0, %v1305_v16 }
  0x23   : > { %186 = vst.msk [vmem:[#allocation2 + $0x78] sm:$0x3] %vm171_vm1, %v1305_v16 }
  0x24   : > { %187 = vst.msk [vmem:[#allocation2 + $0x80] sm:$0xff] %vm169_vm0, %v1305_v16 }
  0x25   : > { %188 = vst.msk [vmem:[#allocation2 + $0x88] sm:$0x3] %vm171_vm1, %v1305_v16 }
  0x26   : > { %189 = vst.msk [vmem:[#allocation2 + $0x90] sm:$0xff] %vm169_vm0, %v1305_v16 }
  0x27   : > { %190 = vst.msk [vmem:[#allocation2 + $0x98] sm:$0x3] %vm171_vm1, %v1305_v16 }
  0x28   : > { %245 = vrot.lane.b32.xlu1 %v1414_v6, %s1304_s29  ;;  %243 = vrot.lane.b32.xlu0 %v1417_v7, %s1304_s29 }
  0x29   : > { %235 = vrot.lane.b32.xlu2 %v1420_v8, %s1304_s29 }
  0x30   : > { %247 = vrot.lane.b32.xlu1 %v1429_v9, %s1304_s29  ;;  %237 = vrot.lane.b32.xlu0 %v1432_v10, %s1304_s29 }
  0x31   : > { %249 = vrot.lane.b32.xlu2 %v1435_v11, %s1304_s29 }
  0x38   : > { %239 = vrot.lane.b32.xlu0 %v1444_v12, %s1304_s29  ;;  %241 = vrot.lane.b32.xlu1 %v1447_v13, %s1304_s29 }
  0x39   : > { %251 = vrot.lane.b32.xlu2 %v1450_v14, %s1304_s29 }
  0x40   : > { %253 = vrot.lane.b32.xlu0 %v1459_v15, %s1304_s29  ;;  %s161_s29 = sand.u32 1, %s1294_s13  }
  0x41   : > { %s1063_s11 = scalar_lea.sflag [#allocation4], %s161_s29 }
  0x73   : > { %v232_v17 = vpop.permute.xlu2 %231 }
  0x74   : > { %v275_v18 = vmax.f32 %v195_v2, %v232_v17 }
  0x7b   : > { %v234_v19 = vpop.permute.xlu2 %233 }
  0x7c   : > { %v276_v20 = vmax.f32 %v196_v5, %v234_v19  ;;  %v1517_v5 = vld [vmem:[#allocation2 + $0x92] sm:$0xff] }
  0x7e   : > { %v289_v21 = vmax.f32 %v275_v18, %v276_v20 }
  0x80   : > { %299 = vst.msk [vmem:[#allocation2 + $0x31] sm:$0xff] %vm296_vm2, %v289_v21 }
  0x83   : > { %v236_v30 = vpop.permute.xlu2 %235 }
  0x84   : > { %v277_v45 = vmax.f32 %v1420_v8, %v236_v30 }
  0x87   : > { %v323_v50 = vld [vmem:[#allocation2 + $0x31] sm:$0xff] }
  0x88   : > { %v333_v51 = vld [vmem:[#allocation2 + $0x32] sm:$0xff] }
  0x8a   : > { %v228_v22 = vpop.permute.xlu1 %227  ;;  %v224_v23 = vpop.permute.xlu0 %223 }
  0x8b   : > { %v273_v26 = vmax.f32 %v1390_v0, %v228_v22  ;;  %v271_v27 = vmax.f32 %v1393_v1, %v224_v23  ;;  %v250_v39 = vpop.permute.xlu2 %249  ;;  %v313_v22 = vld [vmem:[#allocation2 + $0x30] sm:$0xff] }
  0x8c   : > { %v284_v42 = vmax.f32 %v1435_v11, %v250_v39  ;;  %v1529_v11 = vld [vmem:[#allocation2 + $0x1] sm:$0xff] }
  0x92   : > { %v230_v24 = vpop.permute.xlu1 %229  ;;  %v226_v25 = vpop.permute.xlu0 %225 }
  0x93   : > { %v274_v28 = vmax.f32 %v1402_v3, %v230_v24  ;;  %v272_v29 = vmax.f32 %v1405_v4, %v226_v25  ;;  %v252_v59 = vpop.permute.xlu2 %251 }
  0x94   : > { %v285_v62 = vmax.f32 %v1450_v14, %v252_v59  ;;  %v308_v59 = vld [vmem:[%s1881_s1 + $0x18] sm:$0xff] }
  0x95   : > { %v288_v31 = vmax.f32 %v273_v26, %v274_v28  ;;  %v287_v32 = vmax.f32 %v271_v27, %v272_v29 }
  0x97   : > { %298 = vst.msk [vmem:[#allocation2 + $0x21] sm:$0xff] %vm296_vm2, %v288_v31 }
  0x98   : > { %297 = vst.msk [vmem:[#allocation2 + $0x11] sm:$0xff] %vm296_vm2, %v287_v32 }
  0x9a   : > { %v246_v33 = vpop.permute.xlu1 %245  ;;  %v244_v34 = vpop.permute.xlu0 %243 }
  0x9b   : > { %v282_v35 = vmax.f32 %v1414_v6, %v246_v33  ;;  %v281_v36 = vmax.f32 %v1417_v7, %v244_v34 }
  0x9d   : > { %v292_v37 = vmax.f32 %v281_v36, %v282_v35 }
  0x9e   : > { %v322_v38 = vld [vmem:[#allocation2 + $0x21] sm:$0xff] }
  0x9f   : > { %302 = vst.msk [vmem:[#allocation2 + $0x61] sm:$0xff] %vm296_vm2, %v292_v37  ;;  %354 = vrot.lane.b32.xlu2 %v322_v38, %s1306_s30  ;;  %v331_v40 = vld [vmem:[#allocation2 + $0x12] sm:$0xff]  ;;  %v332_v52 = vld [vmem:[#allocation2 + $0x22] sm:$0xff] }
  0xa0   : > { %v321_v41 = vld [vmem:[#allocation2 + $0x11] sm:$0xff]  ;;  %392 = vrot.lane.b32.xlu0 %v331_v40, %s1307_s4  ;;  %v312_v21 = vld [vmem:[#allocation2 + $0x20] sm:$0xff] }
  0xa1   : > { %352 = vrot.lane.b32.xlu1 %v321_v41, %s1306_s30  ;;  %v311_v16 = vld [vmem:[#allocation2 + $0x10] sm:$0xff] }
  0xa2   : > { %v248_v43 = vpop.permute.xlu1 %247  ;;  %v238_v44 = vpop.permute.xlu0 %237 }
  0xa3   : > { %v283_v46 = vmax.f32 %v1429_v9, %v248_v43  ;;  %v278_v47 = vmax.f32 %v1432_v10, %v238_v44  ;;  %v1523_v10 = vld [vmem:[#allocation2 + $0x91] sm:$0xff] }
  0xa5   : > { %v293_v48 = vmax.f32 %v283_v46, %v284_v42  ;;  %v290_v49 = vmax.f32 %v277_v45, %v278_v47 }
  0xa6   : > { %v326_v60 = vld [vmem:[#allocation2 + $0x61] sm:$0xff] }
  0xa7   : > { %303 = vst.msk [vmem:[#allocation2 + $0x71] sm:$0xff] %vm296_vm2, %v293_v48  ;;  %356 = vrot.lane.b32.xlu2 %v323_v50, %s1306_s30  ;;  %v336_v3 = vld [vmem:[#allocation2 + $0x62] sm:$0xff] }
  0xa8   : > { %300 = vst.msk [vmem:[#allocation2 + $0x41] sm:$0xff] %vm296_vm2, %v290_v49  ;;  %396 = vrot.lane.b32.xlu0 %v333_v51, %s1307_s4  ;;  %v316_v35 = vld [vmem:[#allocation2 + $0x60] sm:$0xff] }
  0xa9   : > { %394 = vrot.lane.b32.xlu1 %v332_v52, %s1307_s4 }
  0xaa   : > { %v240_v53 = vpop.permute.xlu0 %239  ;;  %v242_v54 = vpop.permute.xlu1 %241 }
  0xab   : > { %v279_v55 = vmax.f32 %v1444_v12, %v240_v53  ;;  %v280_v56 = vmax.f32 %v1447_v13, %v242_v54  ;;  %v1531_v12 = vld [vmem:[#allocation2 + $0x2] sm:$0xff]  ;;  %v1587_v54 = vld [vmem:[#allocation2 + $0x90] sm:$0xff] }
  0xad   : > { %v291_v57 = vmax.f32 %v279_v55, %v280_v56 }
  0xae   : > { %v327_v58 = vld [vmem:[#allocation2 + $0x71] sm:$0xff] }
  0xaf   : > { %v324_v61 = vld [vmem:[#allocation2 + $0x41] sm:$0xff]  ;;  %301 = vst.msk [vmem:[#allocation2 + $0x51] sm:$0xff] %vm296_vm2, %v291_v57  ;;  %v337_v2 = vld [vmem:[#allocation2 + $0x72] sm:$0xff] }
  0xb0   : > { %364 = vrot.lane.b32.xlu0 %v327_v58, %s1306_s30  ;;  %358 = vrot.lane.b32.xlu2 %v324_v61, %s1306_s30  ;;  %v334_v4 = vld [vmem:[#allocation2 + $0x42] sm:$0xff]  ;;  %v317_v36 = vld [vmem:[#allocation2 + $0x70] sm:$0xff] }
  0xb1   : > { %362 = vrot.lane.b32.xlu1 %v326_v60, %s1306_s30  ;;  %v314_v30 = vld [vmem:[#allocation2 + $0x40] sm:$0xff]  ;;  %v307_v60 = vld [vmem:[%s1881_s1 + $0x10] sm:$0xff]  ;;  %v306_v61 = vld [vmem:[%s1881_s1 + $0x8] sm:$0xff] }
  0xb2   : > { %v254_v63 = vpop.permute.xlu0 %253  ;;  %v309_v58 = vld [vmem:[%s1881_s1 + $0x20] sm:$0xf] }
  0xb3   : > { %v286_v0 = vmax.f32 %v1459_v15, %v254_v63  ;;  %1147 = vmatpush.msk.msra.mxu0 %vm540_vm3, %v309_v58  ;;  %1171 = vmatpush.msk.msra.mxu3 %vm540_vm3, %v309_v58 }
  0xb5   : > { %v294_v1 = vmax.f32 %v285_v62, %v286_v0  ;;  %556 = vmatpush.msra.mxu0 %v308_v59  ;;  %1172 = vmatpush.msra.mxu3 %v308_v59  ;;  %v305_v62 = vld [vmem:[%s1881_s1] sm:$0xff] }
  0xb6   : > { %v325_v6 = vld [vmem:[#allocation2 + $0x51] sm:$0xff] }
  0xb7   : > { %304 = vst.msk [vmem:[#allocation2 + $0x81] sm:$0xff] %vm296_vm2, %v294_v1  ;;  %v335_v8 = vld [vmem:[#allocation2 + $0x52] sm:$0xff]  ;;  %557 = vmatpush.msra.mxu0 %v307_v60  ;;  %1173 = vmatpush.msra.mxu3 %v307_v60  ;;  %v1612_v1 = vld [vmem:[#allocation2] sm:$0xff] }
  0xb8   : > { %404 = vrot.lane.b32.xlu0 %v337_v2, %s1307_s4  ;;  %398 = vrot.lane.b32.xlu2 %v334_v4, %s1307_s4  ;;  %v315_v47 = vld [vmem:[#allocation2 + $0x50] sm:$0xff] }
  0xb9   : > { %402 = vrot.lane.b32.xlu1 %v336_v3, %s1307_s4  ;;  %558 = vmatpush.msra.mxu0 %v306_v61 }
  0xba   : > { %1174 = vmatpush.msra.mxu3 %v306_v61 }
  0xbb   : > { %559 = vmatpush.msra.mxu0 %v305_v62 }
  0xbc   : > { %1175 = vmatpush.msra.mxu3 %v305_v62 }
  0xbe   : > { %v328_v7 = vld [vmem:[#allocation2 + $0x81] sm:$0xff] }
  0xbf   : > { %v338_v9 = vld [vmem:[#allocation2 + $0x82] sm:$0xff] }
  0xc0   : > { %408 = vrot.lane.b32.xlu0 %v1517_v5, %s1307_s4  ;;  %366 = vrot.lane.b32.xlu2 %v328_v7, %s1306_s30  ;;  %v318_v46 = vld [vmem:[#allocation2 + $0x80] sm:$0xff] }
  0xc1   : > { %360 = vrot.lane.b32.xlu1 %v325_v6, %s1306_s30 }
  0xc8   : > { %400 = vrot.lane.b32.xlu0 %v335_v8, %s1307_s4  ;;  %368 = vrot.lane.b32.xlu2 %v1523_v10, %s1306_s30 }
  0xc9   : > { %406 = vrot.lane.b32.xlu1 %v338_v9, %s1307_s4 }
  0xd0   : > { %390 = vrot.lane.b32.xlu2 %v1531_v12, %s1307_s4 }
  0xd1   : > { %350 = vrot.lane.b32.xlu1 %v1529_v11, %s1306_s30  ;;  %s1144_s30 = sshll.u32 %s161_s29, 6 }
  0xd2   : > { %s163_s9 = scalar_lea.vmem [#allocation3], %s1144_s30 }
  0xf9   : > { %v355_v13 = vpop.permute.xlu2 %354 }
  0xfa   : > { %v422_v23 = vsel %vm296_vm2, %v312_v21, %v355_v13 }
 0x101   : > { %v357_v14 = vpop.permute.xlu2 %356 }
 0x102   : > { %v423_v24 = vsel %vm296_vm2, %v313_v22, %v357_v14 }
 0x10a   : > { %v359_v20 = vpop.permute.xlu2 %358 }
 0x10b   : > { %v424_v33 = vsel %vm296_vm2, %v314_v30, %v359_v20 }
 0x112   : > { %v393_v17 = vpop.permute.xlu0 %392  ;;  %v399_v29 = vpop.permute.xlu2 %398 }
 0x113   : > { %v353_v15 = vpop.permute.xlu1 %352  ;;  %v1561_v34 = vsel %vm169_vm0, %v424_v33, %v399_v29 }
 0x114   : > { %v421_v18 = vsel %vm296_vm2, %v311_v16, %v353_v15 }
 0x115   : > { %v1539_v19 = vsel %vm169_vm0, %v421_v18, %v393_v17 }
 0x116   : > { %448 = vrot.lane.b32.xlu0 %v1539_v19, %s1308_s5 }
 0x11a   : > { %v397_v26 = vpop.permute.xlu0 %396  ;;  %v367_v45 = vpop.permute.xlu2 %366 }
 0x11b   : > { %v395_v25 = vpop.permute.xlu1 %394  ;;  %v1549_v28 = vsel %vm169_vm0, %v423_v24, %v397_v26  ;;  %v428_v48 = vsel %vm296_vm2, %v318_v46, %v367_v45 }
 0x11c   : > { %v1546_v27 = vsel %vm169_vm0, %v422_v23, %v395_v25 }
 0x11d   : > { %473 = vrot.lane.b32.xlu1 %v1546_v27, %s1309_s6  ;;  %450 = vrot.lane.b32.xlu2 %v1546_v27, %s1308_s5 }
 0x11e   : > { %475 = vrot.lane.b32.xlu0 %v1549_v28, %s1309_s6 }
 0x122   : > { %v365_v32 = vpop.permute.xlu0 %364  ;;  %v369_v55 = vpop.permute.xlu2 %368 }
 0x123   : > { %v363_v31 = vpop.permute.xlu1 %362  ;;  %v427_v38 = vsel %vm296_vm2, %v317_v36, %v365_v32  ;;  %v429_v56 = vsel %vm296_vm2, %v1587_v54, %v369_v55 }
 0x124   : > { %v426_v37 = vsel %vm296_vm2, %v316_v35, %v363_v31 }
 0x125   : > { %452 = vrot.lane.b32.xlu1 %v1549_v28, %s1308_s5 }
 0x126   : > { %477 = vrot.lane.b32.xlu0 %v1561_v34, %s1309_s6 }
 0x12a   : > { %v405_v40 = vpop.permute.xlu0 %404  ;;  %v391_v63 = vpop.permute.xlu2 %390 }
 0x12b   : > { %v403_v39 = vpop.permute.xlu1 %402  ;;  %v1571_v42 = vsel %vm169_vm0, %v427_v38, %v405_v40 }
 0x12c   : > { %v1568_v41 = vsel %vm169_vm0, %v426_v37, %v403_v39 }
 0x12d   : > { %458 = vrot.lane.b32.xlu2 %v1568_v41, %s1308_s5  ;;  %483 = vrot.lane.b32.xlu1 %v1571_v42, %s1309_s6 }
 0x12e   : > { %460 = vrot.lane.b32.xlu0 %v1571_v42, %s1308_s5 }
 0x132   : > { %v409_v44 = vpop.permute.xlu0 %408 }
 0x133   : > { %v361_v43 = vpop.permute.xlu1 %360  ;;  %v439_v57 = vsel %vm169_vm0, %v429_v56, %v409_v44 }
 0x134   : > { %v425_v49 = vsel %vm296_vm2, %v315_v47, %v361_v43 }
 0x135   : > { %454 = vrot.lane.b32.xlu2 %v1561_v34, %s1308_s5 }
 0x13a   : > { %v401_v51 = vpop.permute.xlu0 %400 }
 0x13b   : > { %v407_v50 = vpop.permute.xlu1 %406  ;;  %v435_v53 = vsel %vm169_vm0, %v425_v49, %v401_v51 }
 0x13c   : > { %v438_v52 = vsel %vm169_vm0, %v428_v48, %v407_v50  ;;  %456 = vrot.lane.b32.xlu0 %v435_v53, %s1308_s5  ;;  %479 = vrot.lane.b32.xlu1 %v435_v53, %s1309_s6 }
 0x13d   : > { %485 = vrot.lane.b32.xlu2 %v438_v52, %s1309_s6 }
 0x143   : > { %v351_v0 = vpop.permute.xlu1 %350 }
 0x144   : > { %487 = vrot.lane.b32.xlu0 %v439_v57, %s1309_s6  ;;  %462 = vrot.lane.b32.xlu1 %v438_v52, %s1308_s5  ;;  %v420_v3 = vsel %vm296_vm2, %v1612_v1, %v351_v0  ;;  %s1170_s5 = sshll.u32 %s1355_s16, 6  ;;  %s1075_s16 = sshll.u32 %s163_s9, 4  ;;  %s1076_s16 = int_to_ptr.vmem [resolvable:$true] %s1075_s16 }
 0x145   : > { %481 = vrot.lane.b32.xlu2 %v1568_v41, %s1309_s6  ;;  %v430_v6 = vsel %vm169_vm0, %v420_v3, %v391_v63 }
 0x177   : > { %v451_v4 = vpop.permute.xlu2 %450 }
 0x178   : > { %v499_v15 = vsel %vm497_vm5, %v1539_v19, %v451_v4 }
 0x187   : > { %v459_v14 = vpop.permute.xlu2 %458 }
 0x188   : > { %v449_v2 = vpop.permute.xlu0 %448  ;;  %v503_v22 = vsel %vm497_vm5, %v435_v53, %v459_v14 }
 0x189   : > { %v498_v7 = vsel %vm497_vm5, %v430_v6, %v449_v2 }
 0x18f   : > { %v474_v8 = vpop.permute.xlu1 %473  ;;  %v455_v20 = vpop.permute.xlu2 %454 }
 0x190   : > { %v476_v9 = vpop.permute.xlu0 %475  ;;  %v507_v13 = vsel %vm506_vm4, %v498_v7, %v474_v8  ;;  %v501_v31 = vsel %vm497_vm5, %v1549_v28, %v455_v20 }
 0x191   : > { %1148 = vmatmul.msk.f32.vlgmr.msra.gmra.mxu0 %vm515_vm6, %v507_v13  ;;  %v508_v18 = vsel %vm506_vm4, %v499_v15, %v476_v9 }
 0x197   : > { %v453_v16 = vpop.permute.xlu1 %452  ;;  %v486_v29 = vpop.permute.xlu2 %485 }
 0x198   : > { %v478_v17 = vpop.permute.xlu0 %477  ;;  %v500_v21 = vsel %vm497_vm5, %v1546_v27, %v453_v16 }
 0x199   : > { %1149 = vmatmul.msk.f32.gmra.mxu0 %vm515_vm6, %v508_v18  ;;  %v509_v24 = vsel %vm506_vm4, %v500_v21, %v478_v17 }
 0x19f   : > { %v484_v23 = vpop.permute.xlu1 %483  ;;  %v482_v37 = vpop.permute.xlu2 %481 }
 0x1a0   : > { %v512_v25 = vsel %vm506_vm4, %v503_v22, %v484_v23  ;;  %v461_v19 = vpop.permute.xlu0 %460 }
 0x1a1   : > { %1150 = vmatmul.msk.f32.gmra.mxu0 %vm515_vm6, %v509_v24  ;;  %1153 = vmatmul.msk.f32.vlgmr.msra.gmra.mxu3 %vm515_vm6, %v512_v25  ;;  %v504_v26 = vsel %vm497_vm5, %v1568_v41, %v461_v19 }
 0x1a2   : > { %v513_v30 = vsel %vm506_vm4, %v504_v26, %v486_v29 }
 0x1a9   : > { %1154 = vmatmul.msk.f32.gmra.mxu3 %vm515_vm6, %v513_v30 }
 0x1ae   : > { %v457_v27 = vpop.permute.xlu0 %456  ;;  %v480_v32 = vpop.permute.xlu1 %479 }
 0x1af   : > { %v510_v33 = vsel %vm506_vm4, %v501_v31, %v480_v32  ;;  %v502_v35 = vsel %vm497_vm5, %v1561_v34, %v457_v27 }
 0x1b0   : > { %1151 = vmatmul.msk.f32.gmra.mxu0 %vm515_vm6, %v510_v33  ;;  %v511_v40 = vsel %vm506_vm4, %v502_v35, %v482_v37 }
 0x1b6   : > { %v488_v36 = vpop.permute.xlu0 %487  ;;  %v463_v38 = vpop.permute.xlu1 %462 }
 0x1b7   : > { %v505_v39 = vsel %vm497_vm5, %v1571_v42, %v463_v38  ;;  %v1310_v42 = vmov 64.0  }
 0x1b8   : > { %1152 = vmatmul.msk.f32.gmra.mxu0 %vm515_vm6, %v511_v40  ;;  %v514_v28 = vsel %vm506_vm4, %v505_v39, %v488_v36  ;;  %1234 = vrcp.f32 %v1310_v42 }
 0x1b9   : > { %1155 = vmatmul.msk.f32.gmra.mxu3 %vm515_vm6, %v514_v28 }
 0x1be   : > { %v1235_v56 = vpop.eup %1234 }
 0x1bf   : > { %v607_v61 = vmul.f32 64.0, %v1235_v56  ;;  %vm611_vm7 = vweird.f32 %v1235_v56 }
 0x1c1   : > { %v608_v3 = vsub.f32 1.0, %v607_v61 }
 0x1c3   : > { %v609_v7 = vmul.f32 %v1235_v56, %v608_v3 }
 0x1c5   : > { %v610_v13 = vadd.f32 %v1235_v56, %v609_v7 }
 0x1c7   : > { %v1655_v16 = vsel %vm611_vm7, %v1235_v56, %v610_v13 }
 0x20e   : > { %v561_v41 = vpop.f32.mrf.mxu0 }
 0x20f   : > { %v585_v47 = vsel %vm169_vm0, %v561_v41, 0.0 }
 0x216   : > { %v564_v43 = vpop.f32.mrf.mxu0 }
 0x217   : > { %v586_v34 = vsel %vm169_vm0, %v564_v43, 0.0 }
 0x218   : > { %v587_v49 = vadd.f32 %v586_v34, %v585_v47 }
 0x21e   : > { %v567_v44 = vpop.f32.mrf.mxu0 }
 0x21f   : > { %v588_v48 = vsel %vm169_vm0, %v567_v44, 0.0 }
 0x220   : > { %v589_v51 = vadd.f32 %v588_v48, %v587_v49 }
 0x224   : > { %v576_v45 = vpop.f32.mrf.mxu3 }
 0x225   : > { %v594_v59 = vsel %vm169_vm0, %v576_v45, 0.0 }
 0x22c   : > { %v579_v52 = vpop.f32.mrf.mxu3 }
 0x22d   : > { %v570_v46 = vpop.f32.mrf.mxu0  ;;  %v596_v62 = vsel %vm169_vm0, %v579_v52, 0.0 }
 0x22e   : > { %v590_v50 = vsel %vm169_vm0, %v570_v46, 0.0 }
 0x22f   : > { %v591_v53 = vadd.f32 %v590_v50, %v589_v51 }
 0x235   : > { %v573_v55 = vpop.f32.mrf.mxu0 }
 0x236   : > { %v592_v57 = vsel %vm169_vm0, %v573_v55, 0.0 }
 0x237   : > { %v593_v58 = vadd.f32 %v592_v57, %v591_v53 }
 0x239   : > { %v595_v60 = vadd.f32 %v594_v59, %v593_v58 }
 0x23b   : > { %v597_v63 = vadd.f32 %v596_v62, %v595_v60 }
 0x23c   : > { %v582_v0 = vpop.f32.mrf.mxu3 }
 0x23d   : > { %v598_v2 = vsel %vm169_vm0, %v582_v0, 0.0 }
 0x23e   : > { %v599_v4 = vadd.f32 %v598_v2, %v597_v63 }
 0x240   : > { %v600_v6 = vrot.slane %v599_v4, 4 }
 0x242   : > { %v601_v8 = vadd.f32 %v600_v6, %v599_v4 }
 0x244   : > { %v602_v9 = vrot.slane %v601_v8, 2 }
 0x246   : > { %v603_v14 = vadd.f32 %v602_v9, %v601_v8 }
 0x248   : > { %v604_v15 = vrot.slane %v603_v14, 1 }
 0x24a   : > { %v605_v17 = vadd.f32 %v604_v15, %v603_v14 }
 0x24c   : > { %v613_v18 = vmul.f32 %v1655_v16, %v605_v17 }
 0x24e   : > { %v614_v20 = vsub.f32 %v561_v41, %v613_v18  ;;  %v615_v21 = vsub.f32 %v564_v43, %v613_v18  ;;  %v616_v22 = vsub.f32 %v567_v44, %v613_v18  ;;  %v617_v23 = vsub.f32 %v570_v46, %v613_v18 }
 0x24f   : > { %v618_v24 = vsub.f32 %v573_v55, %v613_v18  ;;  %v619_v29 = vsub.f32 %v576_v45, %v613_v18  ;;  %v620_v33 = vsub.f32 %v579_v52, %v613_v18  ;;  %v621_v38 = vsub.f32 %v582_v0, %v613_v18 }
 0x250   : > { %v622_v25 = vmul.f32 %v614_v20, %v614_v20  ;;  %v623_v19 = vmul.f32 %v615_v21, %v615_v21  ;;  %v624_v26 = vmul.f32 %v616_v22, %v616_v22  ;;  %v625_v30 = vmul.f32 %v617_v23, %v617_v23 }
 0x251   : > { %v626_v35 = vmul.f32 %v618_v24, %v618_v24  ;;  %v627_v39 = vmul.f32 %v619_v29, %v619_v29  ;;  %v628_v41 = vmul.f32 %v620_v33, %v620_v33  ;;  %v629_v45 = vmul.f32 %v621_v38, %v621_v38 }
 0x252   : > { %v630_v27 = vsel %vm169_vm0, %v622_v25, 0.0  ;;  %v631_v31 = vsel %vm169_vm0, %v623_v19, 0.0  ;;  %v633_v36 = vsel %vm169_vm0, %v624_v26, 0.0  ;;  %v635_v40 = vsel %vm169_vm0, %v625_v30, 0.0 }
 0x253   : > { %v632_v32 = vadd.f32 %v631_v31, %v630_v27  ;;  %v637_v43 = vsel %vm169_vm0, %v626_v35, 0.0  ;;  %v639_v46 = vsel %vm169_vm0, %v627_v39, 0.0  ;;  %v641_v47 = vsel %vm169_vm0, %v628_v41, 0.0 }
 0x254   : > { %v643_v42 = vsel %vm169_vm0, %v629_v45, 0.0 }
 0x255   : > { %v634_v37 = vadd.f32 %v633_v36, %v632_v32 }
 0x257   : > { %v636_v28 = vadd.f32 %v635_v40, %v634_v37 }
 0x259   : > { %v638_v44 = vadd.f32 %v637_v43, %v636_v28 }
 0x25b   : > { %v640_v34 = vadd.f32 %v639_v46, %v638_v44 }
 0x25d   : > { %v642_v48 = vadd.f32 %v641_v47, %v640_v34 }
 0x25f   : > { %v644_v49 = vadd.f32 %v643_v42, %v642_v48 }
 0x261   : > { %v645_v50 = vrot.slane %v644_v49, 4 }
 0x263   : > { %v646_v51 = vadd.f32 %v645_v50, %v644_v49 }
 0x265   : > { %v647_v52 = vrot.slane %v646_v51, 2 }
 0x267   : > { %v648_v53 = vadd.f32 %v647_v52, %v646_v51 }
 0x269   : > { %v649_v55 = vrot.slane %v648_v53, 1 }
 0x26b   : > { %v650_v56 = vadd.f32 %v649_v55, %v648_v53 }
 0x26d   : > { %v651_v57 = vmul.f32 %v650_v56, %v1655_v16 }
 0x26f   : > { %v652_v58 = vadd.f32 1e-05, %v651_v57 }
 0x271   : > { %1236 = vrsqrt.f32 %v652_v58  ;;  %vm659_vm9 = vweird.f32 %v652_v58 }
 0x277   : > { %v1237_v59 = vpop.eup %1236 }
 0x278   : > { %v654_v60 = vmul.f32 %v1237_v59, %v652_v58  ;;  %vm660_vm8 = vweird.f32 %v1237_v59 }
 0x279   : > { %vm661_vm10 = vmor %vm659_vm9, %vm660_vm8 }
 0x27a   : > { %v655_v61 = vmul.f32 %v1237_v59, %v654_v60 }
 0x27c   : > { %v656_v62 = vmul.f32 0.5, %v655_v61 }
 0x27e   : > { %v657_v63 = vsub.f32 1.5, %v656_v62 }
 0x280   : > { %v658_v0 = vmul.f32 %v1237_v59, %v657_v63 }
 0x282   : > { %v662_v2 = vsel %vm661_vm10, %v1237_v59, %v658_v0 }
 0x283   : > { %v663_v3 = vmul.f32 %v662_v2, %v614_v20  ;;  %v664_v4 = vmul.f32 %v662_v2, %v615_v21  ;;  %v665_v6 = vmul.f32 %v662_v2, %v616_v22  ;;  %v666_v7 = vmul.f32 %v662_v2, %v617_v23 }
 0x284   : > { %v669_v8 = vmul.f32 %v662_v2, %v620_v33  ;;  %v670_v9 = vmul.f32 %v662_v2, %v621_v38  ;;  %v667_v13 = vmul.f32 %v662_v2, %v618_v24  ;;  %v668_v15 = vmul.f32 %v662_v2, %v619_v29 }
 0x285   : > { %v671_v14 = vmax.f32 %v663_v3, 0.0  ;;  %v672_v17 = vmax.f32 %v664_v4, 0.0  ;;  %v673_v19 = vmax.f32 %v665_v6, 0.0  ;;  %v674_v26 = vmax.f32 %v666_v7, 0.0 }
 0x286   : > { %v677_v18 = vmax.f32 %v669_v8, 0.0  ;;  %v678_v25 = vmax.f32 %v670_v9, 0.0  ;;  %v675_v30 = vmax.f32 %v667_v13, 0.0  ;;  %v676_v20 = vmax.f32 %v668_v15, 0.0 }
 0x287   : > { %679 = vst.msk [vmem:[#allocation2 + $0x11] sm:$0xff] %vm169_vm0, %v671_v14 }
 0x288   : > { %685 = vst.msk [vmem:[#allocation2 + $0x71] sm:$0xff] %vm169_vm0, %v677_v18 }
 0x289   : > { %686 = vst.msk [vmem:[#allocation2 + $0x81] sm:$0xff] %vm169_vm0, %v678_v25 }
 0x28a   : > { %680 = vst.msk [vmem:[#allocation2 + $0x21] sm:$0xff] %vm169_vm0, %v672_v17 }
 0x28b   : > { %681 = vst.msk [vmem:[#allocation2 + $0x31] sm:$0xff] %vm169_vm0, %v673_v19 }
 0x28c   : > { %682 = vst.msk [vmem:[#allocation2 + $0x41] sm:$0xff] %vm169_vm0, %v674_v26 }
 0x28d   : > { %683 = vst.msk [vmem:[#allocation2 + $0x51] sm:$0xff] %vm169_vm0, %v675_v30 }
 0x28e   : > { %684 = vst.msk [vmem:[#allocation2 + $0x61] sm:$0xff] %vm169_vm0, %v676_v20  ;;  %v717_v21 = vld [vmem:[#allocation2 + $0x12] sm:$0xff]  ;;  %v695_v20 = vld [vmem:[%s1882_s2 + $0x40] sm:$0xff] }
 0x28f   : > { %v707_v22 = vld [vmem:[#allocation2 + $0x11] sm:$0xff]  ;;  %778 = vrot.lane.b32.xlu0 %v717_v21, %s1311_s26  ;;  %933 = vmatpush.msra.mxu1 %v695_v20 }
 0x290   : > { %738 = vrot.lane.b32.xlu1 %v707_v22, %s1307_s4  ;;  %v723_v35 = vld [vmem:[#allocation2 + $0x72] sm:$0xff]  ;;  %v714_v38 = vld [vmem:[#allocation2 + $0x81] sm:$0xff]  ;;  %1176 = vmatpush.msra.mxu2 %v695_v20 }
 0x291   : > { %v708_v23 = vld [vmem:[#allocation2 + $0x21] sm:$0xff]  ;;  %v713_v37 = vld [vmem:[#allocation2 + $0x71] sm:$0xff] }
 0x292   : > { %740 = vrot.lane.b32.xlu2 %v708_v23, %s1307_s4  ;;  %v718_v27 = vld [vmem:[#allocation2 + $0x22] sm:$0xff]  ;;  %v709_v31 = vld [vmem:[#allocation2 + $0x31] sm:$0xff] }
 0x293   : > { %v719_v36 = vld [vmem:[#allocation2 + $0x32] sm:$0xff]  ;;  %v710_v39 = vld [vmem:[#allocation2 + $0x41] sm:$0xff] }
 0x294   : > { %v711_v29 = vld [vmem:[#allocation2 + $0x51] sm:$0xff]  ;;  %v720_v40 = vld [vmem:[#allocation2 + $0x42] sm:$0xff] }
 0x295   : > { %v712_v24 = vld [vmem:[#allocation2 + $0x61] sm:$0xff]  ;;  %v721_v32 = vld [vmem:[#allocation2 + $0x52] sm:$0xff] }
 0x296   : > { %v722_v33 = vld [vmem:[#allocation2 + $0x62] sm:$0xff]  ;;  %v701_v52 = vld [vmem:[#allocation2 + $0x50] sm:$0xff]  ;;  %v694_v21 = vld [vmem:[%s1882_s2 + $0x38] sm:$0xff] }
 0x297   : > { %748 = vrot.lane.b32.xlu0 %v712_v24, %s1307_s4  ;;  %v724_v28 = vld [vmem:[#allocation2 + $0x82] sm:$0xff]  ;;  %v703_v59 = vld [vmem:[#allocation2 + $0x70] sm:$0xff]  ;;  %934 = vmatpush.msra.mxu1 %v694_v21  ;;  %v690_v24 = vld [vmem:[%s1882_s2 + $0x18] sm:$0xff] }
 0x298   : > { %746 = vrot.lane.b32.xlu1 %v711_v29, %s1307_s4  ;;  %v698_v43 = vld [vmem:[#allocation2 + $0x20] sm:$0xff]  ;;  %v699_v60 = vld [vmem:[#allocation2 + $0x30] sm:$0xff]  ;;  %1177 = vmatpush.msra.mxu2 %v694_v21  ;;  %v692_v22 = vld [vmem:[%s1882_s2 + $0x28] sm:$0xff] }
 0x299   : > { %v702_v47 = vld [vmem:[#allocation2 + $0x60] sm:$0xff]  ;;  %v689_v29 = vld [vmem:[%s1882_s2 + $0x10] sm:$0xff] }
 0x29a   : > { %780 = vrot.lane.b32.xlu2 %v718_v27, %s1311_s26  ;;  %v700_v4 = vld [vmem:[#allocation2 + $0x40] sm:$0xff]  ;;  %v688_v27 = vld [vmem:[%s1882_s2 + $0x8] sm:$0xff] }
 0x29b   : > { %v704_v14 = vld [vmem:[#allocation2 + $0x80] sm:$0xff] }
 0x29c   : > { %v691_v23 = vld [vmem:[%s1882_s2 + $0x20] sm:$0xff] }
 0x29f   : > { %742 = vrot.lane.b32.xlu0 %v709_v31, %s1307_s4  ;;  %v687_v31 = vld [vmem:[%s1882_s2] sm:$0xff] }
 0x2a0   : > { %786 = vrot.lane.b32.xlu1 %v721_v32, %s1311_s26 }
 0x2a2   : > { %788 = vrot.lane.b32.xlu2 %v722_v33, %s1311_s26 }
 0x2a7   : > { %790 = vrot.lane.b32.xlu0 %v723_v35, %s1311_s26 }
 0x2a8   : > { %782 = vrot.lane.b32.xlu1 %v719_v36, %s1311_s26 }
 0x2aa   : > { %750 = vrot.lane.b32.xlu2 %v713_v37, %s1307_s4 }
 0x2af   : > { %752 = vrot.lane.b32.xlu0 %v714_v38, %s1307_s4 }
 0x2b0   : > { %744 = vrot.lane.b32.xlu1 %v710_v39, %s1307_s4 }
 0x2b2   : > { %784 = vrot.lane.b32.xlu2 %v720_v40, %s1311_s26 }
 0x2b7   : > { %794 = vrot.lane.b32.xlu0 %v1517_v5, %s1311_s26 }
 0x2b8   : > { %792 = vrot.lane.b32.xlu1 %v724_v28, %s1311_s26 }
 0x2ba   : > { %754 = vrot.lane.b32.xlu2 %v1523_v10, %s1307_s4 }
 0x2c0   : > { %736 = vrot.lane.b32.xlu1 %v1529_v11, %s1307_s4  ;;  %v697_v11 = vld [vmem:[#allocation2 + $0x10] sm:$0xff] }
 0x2c2   : > { %776 = vrot.lane.b32.xlu2 %v1531_v12, %s1311_s26 }
 0x2ec   : > { %v741_v41 = vpop.permute.xlu2 %740 }
 0x2ed   : > { %v808_v44 = vsel %vm169_vm0, %v698_v43, %v741_v41 }
 0x2f4   : > { %v781_v45 = vpop.permute.xlu2 %780 }
 0x2f5   : > { %v1701_v46 = vsel %vm816_vm11, %v808_v44, %v781_v45 }
 0x2f6   : > { %860 = vrot.lane.b32.xlu1 %v1701_v46, %s1312_s27 }
 0x2fc   : > { %v789_v49 = vpop.permute.xlu2 %788 }
 0x2fe   : > { %837 = vrot.lane.b32.xlu1 %v1701_v46, %s1309_s6 }
 0x301   : > { %v779_v5 = vpop.permute.xlu0 %778 }
 0x302   : > { %v739_v10 = vpop.permute.xlu1 %738 }
 0x303   : > { %v807_v12 = vsel %vm169_vm0, %v697_v11, %v739_v10 }
 0x304   : > { %v1709_v34 = vsel %vm816_vm11, %v807_v12, %v779_v5  ;;  %v751_v58 = vpop.permute.xlu2 %750 }
 0x305   : > { %835 = vrot.lane.b32.xlu0 %v1709_v34, %s1309_s6  ;;  %v813_v61 = vsel %vm169_vm0, %v703_v59, %v751_v58 }
 0x309   : > { %v749_v48 = vpop.permute.xlu0 %748 }
 0x30a   : > { %v747_v42 = vpop.permute.xlu1 %746  ;;  %v812_v50 = vsel %vm169_vm0, %v702_v47, %v749_v48 }
 0x30b   : > { %v1715_v51 = vsel %vm816_vm11, %v812_v50, %v789_v49  ;;  %v811_v53 = vsel %vm169_vm0, %v701_v52, %v747_v42 }
 0x30c   : > { %v785_v7 = vpop.permute.xlu2 %784 }
 0x30d   : > { %868 = vrot.lane.b32.xlu0 %v1715_v51, %s1312_s27 }
 0x311   : > { %v743_v55 = vpop.permute.xlu0 %742 }
 0x312   : > { %v787_v56 = vpop.permute.xlu1 %786  ;;  %v809_v62 = vsel %vm169_vm0, %v699_v60, %v743_v55 }
 0x313   : > { %v1721_v57 = vsel %vm816_vm11, %v811_v53, %v787_v56 }
 0x314   : > { %843 = vrot.lane.b32.xlu2 %v1721_v57, %s1309_s6  ;;  %v755_v25 = vpop.permute.xlu2 %754 }
 0x315   : > { %845 = vrot.lane.b32.xlu0 %v1715_v51, %s1309_s6  ;;  %v815_v19 = vsel %vm169_vm0, %v1587_v54, %v755_v25  ;;  %v693_v54 = vld [vmem:[%s1882_s2 + $0x30] sm:$0xff] }
 0x316   : > { %935 = vmatpush.msra.mxu1 %v693_v54  ;;  %1178 = vmatpush.msra.mxu2 %v693_v54 }
 0x318   : > { %936 = vmatpush.msra.mxu1 %v692_v22  ;;  %1179 = vmatpush.msra.mxu2 %v692_v22 }
 0x319   : > { %v791_v63 = vpop.permute.xlu0 %790 }
 0x31a   : > { %v783_v0 = vpop.permute.xlu1 %782  ;;  %v1730_v2 = vsel %vm816_vm11, %v813_v61, %v791_v63  ;;  %937 = vmatpush.msra.mxu1 %v691_v23  ;;  %1180 = vmatpush.msra.mxu2 %v691_v23 }
 0x31b   : > { %v1733_v3 = vsel %vm816_vm11, %v809_v62, %v783_v0  ;;  %870 = vrot.lane.b32.xlu1 %v1730_v2, %s1312_s27 }
 0x31c   : > { %862 = vrot.lane.b32.xlu2 %v1733_v3, %s1312_s27  ;;  %938 = vmatpush.msra.mxu1 %v690_v24  ;;  %v777_v33 = vpop.permute.xlu2 %776 }
 0x31d   : > { %1181 = vmatpush.msra.mxu2 %v690_v24 }
 0x31e   : > { %939 = vmatpush.msra.mxu1 %v689_v29 }
 0x31f   : > { %1182 = vmatpush.msra.mxu2 %v689_v29 }
 0x320   : > { %940 = vmatpush.msra.mxu1 %v688_v27 }
 0x321   : > { %v753_v13 = vpop.permute.xlu0 %752  ;;  %1183 = vmatpush.msra.mxu2 %v688_v27 }
 0x322   : > { %v745_v6 = vpop.permute.xlu1 %744  ;;  %v814_v15 = vsel %vm169_vm0, %v704_v14, %v753_v13  ;;  %941 = vmatpush.msra.mxu1 %v687_v31 }
 0x323   : > { %v810_v8 = vsel %vm169_vm0, %v700_v4, %v745_v6  ;;  %847 = vrot.lane.b32.xlu1 %v1730_v2, %s1309_s6  ;;  %1184 = vmatpush.msra.mxu2 %v687_v31 }
 0x324   : > { %839 = vrot.lane.b32.xlu2 %v1733_v3, %s1309_s6  ;;  %v821_v9 = vsel %vm816_vm11, %v810_v8, %v785_v7 }
 0x325   : > { %864 = vrot.lane.b32.xlu0 %v821_v9, %s1312_s27 }
 0x329   : > { %v795_v26 = vpop.permute.xlu0 %794 }
 0x32a   : > { %v793_v17 = vpop.permute.xlu1 %792  ;;  %v826_v30 = vsel %vm816_vm11, %v815_v19, %v795_v26 }
 0x32b   : > { %v825_v18 = vsel %vm816_vm11, %v814_v15, %v793_v17  ;;  %866 = vrot.lane.b32.xlu1 %v1721_v57, %s1312_s27 }
 0x32c   : > { %872 = vrot.lane.b32.xlu2 %v825_v18, %s1312_s27 }
 0x32d   : > { %841 = vrot.lane.b32.xlu0 %v821_v9, %s1309_s6 }
 0x332   : > { %v737_v32 = vpop.permute.xlu1 %736 }
 0x333   : > { %v806_v35 = vsel %vm169_vm0, %v1612_v1, %v737_v32 }
 0x334   : > { %849 = vrot.lane.b32.xlu2 %v825_v18, %s1309_s6  ;;  %v817_v38 = vsel %vm816_vm11, %v806_v35, %v777_v33  ;;  %s1074_s6 = scalar_lea.hbm %s1883_s3, %s1170_s5 }
 0x335   : > { %874 = vrot.lane.b32.xlu0 %v826_v30, %s1312_s27  ;;  %s1077_s10 = sshll.u32 %s1074_s6, 4  ;;  %s1078_s10 = int_to_ptr.hbm [resolvable:$true] %s1077_s10 }
 0x336   : > { %s1254_s17 = sshra.s32 %s1078_s10, 4  ;;  %s1255_s17 = int_to_ptr.hbm [resolvable:$true] %s1254_s17 }
 0x337   : > { %s1256_s19 = scalar_lea.hbm %s1255_s17, 64  ;;  %p1261_p0 = scmp.lt.s32.totalorder %s1255_s17, %s1883_s3 }
 0x338   : > { %p1257_p11 = scmp.ne.s32.totalorder %s1255_s17, %s1256_s19  ;;  %p1262_p1 = scmp.lt.s32.totalorder %s1260_s25, %s1256_s19 }
 0x33a   : > { %p1258_p12 = pnand %p1257_p11, %p1372_p5  ;;  %p1263_p2 = por %p1262_p1, %p1261_p0 }
 0x33c   : > { %p1259_p13 = pneg %p1258_p12 }
 0x33e   : > { %p1264_p3 = pnand %p1263_p2, %p1259_p13 }
 0x368   : > { %v861_v36 = vpop.permute.xlu1 %860 }
 0x36e   : > { %v844_v37 = vpop.permute.xlu2 %843 }
 0x36f   : > { %v888_v44 = vsel %vm506_vm4, %v821_v9, %v844_v37 }
 0x370   : > { %v838_v41 = vpop.permute.xlu1 %837 }
 0x371   : > { %v885_v1 = vsel %vm506_vm4, %v1709_v34, %v838_v41 }
 0x376   : > { %v863_v43 = vpop.permute.xlu2 %862 }
 0x377   : > { %v836_v39 = vpop.permute.xlu0 %835  ;;  %v894_v10 = vsel %vm892_vm13, %v885_v1, %v863_v43 }
 0x378   : > { %v884_v40 = vsel %vm506_vm4, %v817_v38, %v836_v39 }
 0x379   : > { %v893_v28 = vsel %vm892_vm13, %v884_v40, %v861_v36 }
 0x37a   : > { %1156 = vmatmul.msk.f32.vlgmr.msra.gmra.mxu1 %vm901_vm12, %v893_v28 }
 0x37e   : > { %v840_v12 = vpop.permute.xlu2 %839 }
 0x37f   : > { %v869_v45 = vpop.permute.xlu0 %868  ;;  %v886_v34 = vsel %vm506_vm4, %v1701_v46, %v840_v12 }
 0x380   : > { %v897_v5 = vsel %vm892_vm13, %v888_v44, %v869_v45 }
 0x381   : > { %1160 = vmatmul.msk.f32.vlgmr.msra.gmra.mxu2 %vm901_vm12, %v897_v5 }
 0x382   : > { %1157 = vmatmul.msk.f32.gmra.mxu1 %vm901_vm12, %v894_v10 }
 0x386   : > { %v873_v50 = vpop.permute.xlu2 %872 }
 0x387   : > { %v846_v11 = vpop.permute.xlu0 %845 }
 0x388   : > { %v889_v47 = vsel %vm506_vm4, %v1721_v57, %v846_v11 }
 0x38d   : > { %v871_v48 = vpop.permute.xlu1 %870 }
 0x38e   : > { %v898_v42 = vsel %vm892_vm13, %v889_v47, %v871_v48  ;;  %v850_v60 = vpop.permute.xlu2 %849 }
 0x38f   : > { %1161 = vmatmul.msk.f32.gmra.mxu2 %vm901_vm12, %v898_v42 }
 0x395   : > { %v848_v49 = vpop.permute.xlu1 %847 }
 0x396   : > { %v890_v52 = vsel %vm506_vm4, %v1715_v51, %v848_v49  ;;  %v891_v51 = vsel %vm506_vm4, %v1730_v2, %v850_v60 }
 0x397   : > { %v865_v53 = vpop.permute.xlu0 %864  ;;  %v899_v56 = vsel %vm892_vm13, %v890_v52, %v873_v50 }
 0x398   : > { %v895_v55 = vsel %vm892_vm13, %v886_v34, %v865_v53  ;;  %1162 = vmatmul.msk.f32.gmra.mxu2 %vm901_vm12, %v899_v56 }
 0x399   : > { %1158 = vmatmul.msk.f32.gmra.mxu1 %vm901_vm12, %v895_v55 }
 0x39d   : > { %v867_v58 = vpop.permute.xlu1 %866 }
 0x39f   : > { %v842_v57 = vpop.permute.xlu0 %841 }
 0x3a0   : > { %v887_v59 = vsel %vm506_vm4, %v1733_v3, %v842_v57 }
 0x3a1   : > { %v896_v46 = vsel %vm892_vm13, %v887_v59, %v867_v58 }
 0x3a2   : > { %1159 = vmatmul.msk.f32.gmra.mxu1 %vm901_vm12, %v896_v46 }
 0x3a7   : > { %v875_v61 = vpop.permute.xlu0 %874 }
 0x3a8   : > { %v900_v62 = vsel %vm892_vm13, %v891_v51, %v875_v61 }
 0x3a9   : > { %1163 = vmatmul.msk.f32.gmra.mxu2 %vm901_vm12, %v900_v62 }
 0x3f7   : > { %v943_v63 = vpop.f32.mrf.mxu1 }
 0x3f8   : > { %v967_v8 = vsel %vm169_vm0, %v943_v63, 0.0 }
 0x3ff   : > { %v946_v0 = vpop.f32.mrf.mxu1 }
 0x400   : > { %v968_v7 = vsel %vm169_vm0, %v946_v0, 0.0 }
 0x401   : > { %v969_v13 = vadd.f32 %v968_v7, %v967_v8 }
 0x404   : > { %v955_v4 = vpop.f32.mrf.mxu2 }
 0x405   : > { %v974_v18 = vsel %vm169_vm0, %v955_v4, 0.0 }
 0x412   : > { %v958_v3 = vpop.f32.mrf.mxu2 }
 0x413   : > { %v976_v26 = vsel %vm169_vm0, %v958_v3, 0.0 }
 0x416   : > { %v949_v6 = vpop.f32.mrf.mxu1 }
 0x417   : > { %v970_v9 = vsel %vm169_vm0, %v949_v6, 0.0 }
 0x418   : > { %v971_v14 = vadd.f32 %v970_v9, %v969_v13 }
 0x41b   : > { %v961_v25 = vpop.f32.mrf.mxu2 }
 0x41c   : > { %v978_v20 = vsel %vm169_vm0, %v961_v25, 0.0 }
 0x41f   : > { %v952_v15 = vpop.f32.mrf.mxu1 }
 0x420   : > { %v972_v2 = vsel %vm169_vm0, %v952_v15, 0.0 }
 0x421   : > { %v973_v17 = vadd.f32 %v972_v2, %v971_v14 }
 0x423   : > { %v975_v19 = vadd.f32 %v974_v18, %v973_v17 }
 0x425   : > { %v977_v30 = vadd.f32 %v976_v26, %v975_v19 }
 0x427   : > { %v979_v54 = vadd.f32 %v978_v20, %v977_v30 }
 0x42c   : > { %v964_v21 = vpop.f32.mrf.mxu2 }
 0x42d   : > { %v980_v22 = vsel %vm169_vm0, %v964_v21, 0.0 }
 0x42e   : > { %v981_v23 = vadd.f32 %v980_v22, %v979_v54 }
 0x430   : > { %v982_v24 = vrot.slane %v981_v23, 4 }
 0x432   : > { %v983_v29 = vadd.f32 %v982_v24, %v981_v23 }
 0x434   : > { %v984_v27 = vrot.slane %v983_v29, 2 }
 0x436   : > { %v985_v31 = vadd.f32 %v984_v27, %v983_v29 }
 0x438   : > { %v986_v32 = vrot.slane %v985_v31, 1 }
 0x43a   : > { %v987_v33 = vadd.f32 %v986_v32, %v985_v31 }
 0x43c   : > { %v988_v35 = vmul.f32 %v987_v33, %v1655_v16 }
 0x43e   : > { %v989_v36 = vsub.f32 %v943_v63, %v988_v35  ;;  %v990_v37 = vsub.f32 %v946_v0, %v988_v35  ;;  %v991_v38 = vsub.f32 %v949_v6, %v988_v35  ;;  %v992_v39 = vsub.f32 %v952_v15, %v988_v35 }
 0x43f   : > { %v993_v40 = vsub.f32 %v955_v4, %v988_v35  ;;  %v994_v44 = vsub.f32 %v958_v3, %v988_v35  ;;  %v995_v11 = vsub.f32 %v961_v25, %v988_v35  ;;  %v996_v42 = vsub.f32 %v964_v21, %v988_v35 }
 0x440   : > { %v997_v28 = vmul.f32 %v989_v36, %v989_v36  ;;  %v998_v41 = vmul.f32 %v990_v37, %v990_v37  ;;  %v999_v43 = vmul.f32 %v991_v38, %v991_v38  ;;  %v1000_v45 = vmul.f32 %v992_v39, %v992_v39 }
 0x441   : > { %v1001_v12 = vmul.f32 %v993_v40, %v993_v40  ;;  %v1002_v49 = vmul.f32 %v994_v44, %v994_v44  ;;  %v1003_v52 = vmul.f32 %v995_v11, %v995_v11  ;;  %v1004_v56 = vmul.f32 %v996_v42, %v996_v42 }
 0x442   : > { %v1005_v1 = vsel %vm169_vm0, %v997_v28, 0.0  ;;  %v1006_v5 = vsel %vm169_vm0, %v998_v41, 0.0  ;;  %v1008_v47 = vsel %vm169_vm0, %v999_v43, 0.0  ;;  %v1010_v34 = vsel %vm169_vm0, %v1000_v45, 0.0 }
 0x443   : > { %v1007_v10 = vadd.f32 %v1006_v5, %v1005_v1  ;;  %v1012_v53 = vsel %vm169_vm0, %v1001_v12, 0.0  ;;  %v1014_v57 = vsel %vm169_vm0, %v1002_v49, 0.0  ;;  %v1016_v59 = vsel %vm169_vm0, %v1003_v52, 0.0 }
 0x444   : > { %v1018_v60 = vsel %vm169_vm0, %v1004_v56, 0.0 }
 0x445   : > { %v1009_v48 = vadd.f32 %v1008_v47, %v1007_v10 }
 0x447   : > { %v1011_v50 = vadd.f32 %v1010_v34, %v1009_v48 }
 0x449   : > { %v1013_v55 = vadd.f32 %v1012_v53, %v1011_v50 }
 0x44b   : > { %v1015_v58 = vadd.f32 %v1014_v57, %v1013_v55 }
 0x44d   : > { %v1017_v46 = vadd.f32 %v1016_v59, %v1015_v58 }
 0x44f   : > { %v1019_v51 = vadd.f32 %v1018_v60, %v1017_v46 }
 0x451   : > { %v1020_v61 = vrot.slane %v1019_v51, 4 }
 0x453   : > { %v1021_v62 = vadd.f32 %v1020_v61, %v1019_v51 }
 0x455   : > { %v1022_v63 = vrot.slane %v1021_v62, 2 }
 0x457   : > { %v1023_v0 = vadd.f32 %v1022_v63, %v1021_v62 }
 0x459   : > { %v1024_v4 = vrot.slane %v1023_v0, 1 }
 0x45b   : > { %v1025_v6 = vadd.f32 %v1024_v4, %v1023_v0 }
 0x45d   : > { %v1026_v7 = vmul.f32 %v1025_v6, %v1655_v16 }
 0x45f   : > { %v1027_v3 = vadd.f32 1e-05, %v1026_v7 }
 0x461   : > { %1238 = vrsqrt.f32 %v1027_v3  ;;  %vm1034_vm15 = vweird.f32 %v1027_v3 }
 0x467   : > { %v1239_v8 = vpop.eup %1238 }
 0x468   : > { %v1029_v9 = vmul.f32 %v1239_v8, %v1027_v3  ;;  %vm1035_vm14 = vweird.f32 %v1239_v8 }
 0x469   : > { %vm1036_vm1 = vmor %vm1034_vm15, %vm1035_vm14 }
 0x46a   : > { %v1030_v13 = vmul.f32 %v1239_v8, %v1029_v9 }
 0x46c   : > { %v1031_v14 = vmul.f32 0.5, %v1030_v13 }
 0x46e   : > { %v1032_v15 = vsub.f32 1.5, %v1031_v14 }
 0x470   : > { %v1033_v2 = vmul.f32 %v1239_v8, %v1032_v15 }
 0x472   : > { %v1037_v17 = vsel %vm1036_vm1, %v1239_v8, %v1033_v2 }
 0x473   : > { %v1038_v18 = vmul.f32 %v1037_v17, %v989_v36  ;;  %v1039_v25 = vmul.f32 %v1037_v17, %v990_v37  ;;  %v1040_v19 = vmul.f32 %v1037_v17, %v991_v38  ;;  %v1041_v16 = vmul.f32 %v1037_v17, %v992_v39 }
 0x474   : > { %v1042_v26 = vmul.f32 %v1037_v17, %v993_v40  ;;  %v1043_v30 = vmul.f32 %v1037_v17, %v994_v44  ;;  %v1044_v20 = vmul.f32 %v1037_v17, %v995_v11  ;;  %v1045_v23 = vmul.f32 %v1037_v17, %v996_v42 }
 0x475   : > { %v1046_v21 = vmax.f32 %v1038_v18, 0.0  ;;  %v1047_v54 = vmax.f32 %v1039_v25, 0.0  ;;  %v1048_v22 = vmax.f32 %v1040_v19, 0.0  ;;  %v1049_v24 = vmax.f32 %v1041_v16, 0.0 }
 0x476   : > { %v1050_v29 = vmax.f32 %v1042_v26, 0.0  ;;  %v1051_v27 = vmax.f32 %v1043_v30, 0.0  ;;  %v1052_v31 = vmax.f32 %v1044_v20, 0.0  ;;  %v1053_v32 = vmax.f32 %v1045_v23, 0.0 }
 0x477   : > { %1054 = vst.msk [vmem:[%s163_s9] sm:$0xff] %vm169_vm0, %v1046_v21 }
 0x478   : > { %1055 = vst.msk [vmem:[%s163_s9 + $0x8] sm:$0xff] %vm169_vm0, %v1047_v54 }
 0x479   : > { %1056 = vst.msk [vmem:[%s163_s9 + $0x10] sm:$0xff] %vm169_vm0, %v1048_v22 }
 0x47a   : > { %1057 = vst.msk [vmem:[%s163_s9 + $0x18] sm:$0xff] %vm169_vm0, %v1049_v24 }
 0x47b   : > { %1058 = vst.msk [vmem:[%s163_s9 + $0x20] sm:$0xff] %vm169_vm0, %v1050_v29 }
 0x47c   : > { %1059 = vst.msk [vmem:[%s163_s9 + $0x28] sm:$0xff] %vm169_vm0, %v1051_v27 }
 0x47d   : > { %1060 = vst.msk [vmem:[%s163_s9 + $0x30] sm:$0xff] %vm169_vm0, %v1052_v31 }
 0x47e   : > { %1061 = vst.msk [vmem:[%s163_s9 + $0x38] sm:$0xff] %vm169_vm0, %v1053_v32 }
 0x47f   : > { %1267 = shalt.err (!%p1264_p3)
}
 0x480   : > { %s1313_s28 = smov 128  }
 0x481   : > { %1185 = dma.vmem_to_hbm [thread:$0]  (%p1372_p5), %s1076_s16, 1024, %s1078_s10, %s1063_s11, %s1313_s28, %s1313_s28, %s1307_s4  }
 0x482 PF: > { %p1191_p4 = scmp.ge.s32.totalorder %s1302_s15, 2  ;;  %s1092_s29 = sand.u32 1, %s1290_s12  }
 0x483   : > { %s1093_s30 = scalar_lea.sflag [#allocation4], %s1092_s29 }
 0x484   : > { %p1188_p7 = pnand %p1191_p4, %p1376_p6 }
 0x486   : > { %p1189_p8 = pneg %p1188_p7 }
 0x488   : > { %1285 = dma.done.wait (%p1189_p8), %s1093_s30, 1024  }
 0x489   : > { %1287 = vsyncadd (%p1189_p8), %s1093_s30, 4294966272  ;;  %p13_p9 = scmp.ge.s32.totalorder %s1359_s18, 4   ;;  %s1886_s12 = smov %s1294_s13 }
 0x48a   : > { %s1887_s13 = smov %s1298_s14  ;;  %s1888_s14 = smov %s1370_s21 }
 0x48b   : > { %s1889_s15 = smov %s1359_s18  ;;  %15 = sbr.rel (!%p13_p9) target bundleno = 3 (0x3), region = 68 }
 0x490   :  { %1099 = vsyncpa [#allocation4], 1 }
 0x491   :  { %1101 = vsyncpa [#allocation4 + $0x1], 1 }

</bundles_post_ra>
